<compile_context>
chip_gen: v6e
topology: v6e:2x2x1
jax: 0.10.0
libtpu: 0.0.40
codegen_flags: <defaults>
</compile_context>

<pallas_src>
import functools
import math

import jax
import jax.numpy as jnp
from jax.experimental import pallas as pl
from jax.experimental.pallas import tpu as pltpu


def _layer_scale_kernel(x_ref, gamma_ref, o_ref):
    # x_ref: (TILE_ROWS, D_LANE) block; gamma_ref: (1, D_LANE) broadcast row.
    # Multiply in the promoted dtype, downcast (if needed) on store.
    o_ref[...] = (x_ref[...] * gamma_ref[...]).astype(o_ref.dtype)


@functools.lru_cache(maxsize=None)
def _tpu_generation_params():
    """Returns (target_block_bytes, vmem_limit_bytes), chip-generation aware."""
    vmem_cap = 128 << 20
    try:
        vmem_cap = int(pltpu.get_tpu_info().vmem_capacity_bytes)
    except Exception:
        pass
    kind = ""
    try:
        kind = jax.devices()[0].device_kind.lower()
    except Exception:
        pass
    is_v7 = ("v7" in kind) or (vmem_cap <= (64 << 20))
    if is_v7:
        # v7x: bigger tiles to amortize per-step overhead at ~3.2 TB/s, but
        # leave headroom below the 64 MiB physical VMEM (4 x 8 MiB buffers
        # resident + compiler scratch fits comfortably in 48 MiB).
        target_block_bytes = 8 << 20
        vmem_limit_bytes = max(32 << 20, min(48 << 20, vmem_cap - (16 << 20)))
    else:
        # v5e/v6e: 4 MiB tiles already sit at the roofline plateau.
        target_block_bytes = 4 << 20
        vmem_limit_bytes = max(32 << 20, min(64 << 20, vmem_cap // 2))
    return target_block_bytes, vmem_limit_bytes


def _choose_tile_rows(rows: int, row_bytes: int, x_itemsize: int,
                      target_block_bytes: int) -> int:
    """Sublane-aligned row tile near `target_block_bytes`, even >=4-step grid."""
    # Packed sublane multiple: 8 for f32, 16 for bf16/fp16, 32 for int8/fp8.
    packing = max(1, 4 // max(1, x_itemsize))
    sublane = 8 * packing
    if rows <= sublane:
        # Single block equal to the full row extent (allowed by Pallas).
        return rows
    # Largest sublane-aligned tile within the per-block byte budget.
    budget_rows = (target_block_bytes // max(1, row_bytes)) // sublane * sublane
    budget_rows = max(sublane, budget_rows)
    steps = pl.cdiv(rows, budget_rows)
    # Megacore balance (v7x has 2 TCs): prefer an even step count >= 4 when
    # the input is big enough, so both cores get pipelined, balanced work.
    if rows >= 4 * sublane:
        steps = max(steps, 4)
    elif rows >= 2 * sublane:
        steps = max(steps, 2)
    if steps > 1 and steps % 2:
        steps += 1
    tile = pl.cdiv(pl.cdiv(rows, steps), sublane) * sublane
    return max(sublane, min(tile, budget_rows))


def layer_scale(x: jax.Array, gamma: jax.Array, *, inplace: bool = False) -> jax.Array:
    """Computes x * gamma with gamma (shape (D,)) broadcast over x's last axis."""
    d = x.shape[-1]
    assert gamma.shape == (d,), "gamma must match last dim of x"
    orig_shape = x.shape

    # Output dtype: torch promotion for the functional form; x's dtype for the
    # in-place (mul_) form.  (All-f32 case is unaffected either way.)
    out_dtype = x.dtype if inplace else jnp.result_type(x.dtype, gamma.dtype)

    x2 = x.reshape(-1, d)                       # (rows, D)
    rows = x2.shape[0]

    # Lane-dense layout: make the last (lane) dim a multiple of 128 so every
    # store is a full, unmasked 128-lane vst — the biggest measured lever for
    # this bandwidth-bound op.  If rows don't divide the fold factor k, pad at
    # most k-1 (< 128) rows rather than falling back to masked stores.
    k = 1
    pad_rows = 0
    if d % 128 != 0:
        k = 128 // math.gcd(d, 128)
        pad_rows = (-rows) % k
        if pad_rows:
            x2 = jnp.pad(x2, ((0, pad_rows), (0, 0)))
    rows_p = rows + pad_rows
    d_lane = d * k
    rows_l = rows_p // k
    x2 = x2.reshape(rows_l, d_lane)             # pure row-major fold (no reorder)

    gamma_row = gamma.reshape(1, d)
    if k > 1:
        gamma_row = jnp.tile(gamma_row, (1, k))  # (1, k*D) broadcast row

    target_block_bytes, vmem_limit_bytes = _tpu_generation_params()
    out_itemsize = jnp.dtype(out_dtype).itemsize
    row_bytes = d_lane * max(x.dtype.itemsize, out_itemsize)
    tile_rows = _choose_tile_rows(rows_l, row_bytes, x.dtype.itemsize,
                                  target_block_bytes)
    grid = (pl.cdiv(rows_l, tile_rows),)        # partial tail block is masked

    cost = pl.CostEstimate(
        flops=int(x2.size),
        transcendentals=0,
        bytes_accessed=int(x2.size * (x2.dtype.itemsize + out_itemsize)
                           + gamma_row.size * gamma_row.dtype.itemsize),
    )
    # Donate x into the output only for the in-place form (and matching dtype);
    # the functional form must not clobber / force-copy the caller's buffer.
    io_aliases = {0: 0} if (inplace and out_dtype == x2.dtype) else {}

    out = pl.pallas_call(
        _layer_scale_kernel,
        out_shape=jax.ShapeDtypeStruct((rows_l, d_lane), out_dtype),
        grid_spec=pltpu.PrefetchScalarGridSpec(
            num_scalar_prefetch=0,
            grid=grid,
            in_specs=[
                pl.BlockSpec((tile_rows, d_lane), lambda i: (i, 0)),
                pl.BlockSpec((1, d_lane), lambda i: (0, 0)),
            ],
            out_specs=pl.BlockSpec((tile_rows, d_lane), lambda i: (i, 0)),
        ),
        compiler_params=pltpu.CompilerParams(
            dimension_semantics=("parallel",),
            vmem_limit_bytes=vmem_limit_bytes,
        ),
        cost_estimate=cost,
        input_output_aliases=io_aliases,
    )(x2, gamma_row)

    out = out.reshape(rows_p, d)
    if pad_rows:
        out = out[:rows, :]
    return out.reshape(orig_shape)


if __name__ == "__main__":
    key = jax.random.PRNGKey(0)
    init_values = 1e-5

    # --- 1) Module-spec shape (dim=32): 4 rows folded into the lane axis ---
    dim = 32
    gamma = init_values * jnp.ones((dim,), dtype=jnp.float32)
    x = jax.random.normal(key, (2, 8, dim), dtype=jnp.float32)   # (B, N, D)
    y = layer_scale(x, gamma)
    jax.block_until_ready(y)
    assert y.shape == x.shape and y.dtype == x.dtype
    assert jnp.allclose(y, x * gamma, atol=1e-7), "mismatch vs reference (small)"

    # --- 2) D multiple of 128, multi-step (even >=4) grid path ---
    dim2 = 384
    gamma2 = init_values * jnp.ones((dim2,), dtype=jnp.float32)
    x2 = jax.random.normal(jax.random.PRNGKey(1), (4, 196, dim2), dtype=jnp.float32)
    y2 = layer_scale(x2, gamma2)
    jax.block_until_ready(y2)
    assert jnp.allclose(y2, x2 * gamma2, atol=1e-7), "mismatch vs reference (tiled)"

    # --- 3) Row-pad path: D % 128 != 0 and rows not divisible by the fold k ---
    dim3 = 48                                   # k = 8, rows = 10 -> pad 6 rows
    gamma3 = init_values * jnp.ones((dim3,), dtype=jnp.float32)
    x3 = jax.random.normal(jax.random.PRNGKey(2), (2, 5, dim3), dtype=jnp.float32)
    y3 = layer_scale(x3, gamma3)
    jax.block_until_ready(y3)
    assert jnp.allclose(y3, x3 * gamma3, atol=1e-7), "mismatch vs reference (padded)"

    print("KERNEL_OK")
</pallas_src>

<mosaic_0001>
module attributes {stable_mosaic.version = 11 : i64} {
  func.func @_layer_scale_kernel(%arg0: i32, %arg1: memref<4x128xf32, #tpu.memory_space<vmem>>, %arg2: memref<1x128xf32, #tpu.memory_space<vmem>>, %arg3: memref<4x128xf32, #tpu.memory_space<vmem>>) attributes {dimension_semantics = [#tpu.dimension_semantics<parallel>], iteration_bounds = array<i64: 1>, scalar_prefetch = 0 : i64, scratch_operands = 0 : i64, tpu.core_type = #tpu.core_type<tc>, window_params = [{transform_indices = @transform_0, window_bounds = array<i64: 4, 128>}, {pipeline_mode = #tpu.pipeline_mode<synchronous>, transform_indices = @transform_1, window_bounds = array<i64: 1, 128>}, {transform_indices = @transform_2, window_bounds = array<i64: 4, 128>}]} {
    %c0 = arith.constant 0 : index
    %c0_0 = arith.constant 0 : index
    %0 = vector.load %arg1[%c0, %c0_0] : memref<4x128xf32, #tpu.memory_space<vmem>>, vector<4x128xf32>
    %c0_1 = arith.constant 0 : index
    %c0_2 = arith.constant 0 : index
    %1 = vector.load %arg2[%c0_1, %c0_2] : memref<1x128xf32, #tpu.memory_space<vmem>>, vector<1x128xf32>
    %2 = vector.broadcast %1 : vector<1x128xf32> to vector<4x128xf32>
    %3 = arith.mulf %0, %2 : vector<4x128xf32>
    %c0_3 = arith.constant 0 : index
    %c0_4 = arith.constant 0 : index
    %4 = vector.load %arg3[%c0_3, %c0_4] : memref<4x128xf32, #tpu.memory_space<vmem>>, vector<4x128xf32>
    tpu.vector_store %arg3[%c0_3, %c0_4], %3 {strides = array<i32>} : memref<4x128xf32, #tpu.memory_space<vmem>>, vector<4x128xf32>,
    return
  }
  func.func @transform_0(%arg0: i32) -> (i32, i32) {
    %c0_i32 = arith.constant 0 : i32
    %c0_i32_0 = arith.constant 0 : i32
    return %arg0, %c0_i32 : i32, i32
  }
  func.func @transform_1(%arg0: i32) -> (i32, i32) {
    %c0_i32 = arith.constant 0 : i32
    %c0_i32_0 = arith.constant 0 : i32
    %c0_i32_1 = arith.constant 0 : i32
    return %c0_i32, %c0_i32_0 : i32, i32
  }
  func.func @transform_2(%arg0: i32) -> (i32, i32) {
    %c0_i32 = arith.constant 0 : i32
    %c0_i32_0 = arith.constant 0 : i32
    return %arg0, %c0_i32 : i32, i32
  }
}

</mosaic_0001>

<bundles_post_ra>
// kernel: tpu_custom_call.1
= control target key start
LH: loop header
LB: loop body
LE: loop exit
PB: predicated region body
PF: predicated region fallthrough
CT: control target
= control target key end

     0   :  { %7 = vsyncpa [#allocation3], 0  ;;  %s122_s0 = inlined_call_operand.hbm [shape: f32[4,128], index: 0, kind: input, shape index: {}]   ;;  %s123_s1 = inlined_call_operand.vmem [shape: f32[1,128], index: 1, kind: input, shape index: {}]   ;;  %s124_s2 = inlined_call_operand.hbm [shape: f32[4,128], index: 2, kind: output, shape index: {}]  }
   0x1   :  { %8 = vsyncpa [#allocation4], 0  ;;  %s96_s9 = smov [#allocation2]  }
   0x2   :  { %s15_s10 = sshll.u32 %s96_s9, 4  ;;  %s16_s10 = int_to_ptr.vmem [resolvable:$true] %s15_s10 }
   0x3   :  { %s60_s11 = scalar_lea.vmem %s16_s10, 64  ;;  %p65_p1 = scmp.lt.s32.totalorder %s16_s10, %s16_s10 }
   0x4   :  { %p61_p0 = scmp.ne.s32.totalorder %s16_s10, %s60_s11  ;;  %p66_p2 = scmp.lt.s32.totalorder %s60_s11, %s60_s11 }
   0x6   :  { %p67_p3 = por %p66_p2, %p65_p1 }
   0x8   :  { %p68_p4 = pnand %p67_p3, %p61_p0 }
   0xa   :  { %71 = shalt.err (!%p68_p4)
}
   0xb   :  { %18 = dma.hbm_to_vmem [thread:$0]  %s122_s0, 64, %s16_s10, [#allocation3]  }
   0xc   :  { %92 = dma.done.wait [#allocation3], 64  }
   0xd   :  { %93 = vsyncadd [#allocation3], 4294967232  ;;  %s97_s14 = smov [#allocation5]   ;;  %v24_v0 = vld [vmem:[#allocation2] sm:$0xf] }
   0xe   :  { %s40_s15 = sshll.u32 %s97_s14, 4  ;;  %v49_v1 = vld [vmem:[%s123_s1] ss:$0 sm:$0xff]  ;;  %s41_s15 = int_to_ptr.vmem [resolvable:$true] %s40_s15 }
   0xf   :  { %v32_v2 = vmul.f32 %v49_v1, %v24_v0  ;;  %s72_s18 = scalar_lea.vmem %s41_s15, 64  ;;  %p77_p6 = scmp.lt.s32.totalorder %s41_s15, %s41_s15 }
  0x10   :  { %p73_p5 = scmp.ne.s32.totalorder %s41_s15, %s72_s18  ;;  %p78_p7 = scmp.lt.s32.totalorder %s72_s18, %s72_s18 }
  0x11   :  { %33 = vst [vmem:[#allocation5] sm:$0xf] %v32_v2 }
  0x12   :  { %p79_p8 = por %p78_p7, %p77_p6 }
  0x14   :  { %p80_p9 = pnand %p79_p8, %p73_p5 }
  0x16   :  { %83 = shalt.err (!%p80_p9)
}
  0x17   :  { %43 = dma.vmem_to_hbm [thread:$0]  %s41_s15, 64, %s124_s2, [#allocation4]  }
  0x18   :  { %94 = dma.done.wait [#allocation4], 64  }
  0x19   :  { %95 = vsyncadd [#allocation4], 4294967232 }
  0x1a   :  { %47 = vsyncpa [#allocation3], 1 }
  0x1b   :  { %48 = vsyncpa [#allocation4], 1 }

</bundles_post_ra>
